<compile_context>
chip_gen: v7x
topology: tpu7x:2x2x1
jax: 0.10.0
libtpu: 0.0.40
codegen_flags: <defaults>
</compile_context>

<pallas_src>
import jax
import jax.numpy as jnp
import numpy as np
from jax.experimental import pallas as pl
from jax.experimental.pallas import tpu as pltpu

LEAKY_SLOPE = 0.01   # torch.nn.LeakyReLU default
TM_CAP = 32768       # VMEM-safe on v5e/v6e/v7x for this kernel's footprint;
                     # set vmem_limit_bytes explicitly before going beyond.


def _leaky_relu(x):
    # identical to where(x>0, x, slope*x) for 0 < slope < 1, one fewer VALU op
    return jnp.maximum(x, LEAKY_SLOPE * x)


def mlp_kernel(x_ref, w1_ref, b1_ref, w2_ref, b2_ref, w3_ref, b3_ref, o_ref):
    # layer 0: nn.Identity().  Everything is (C, N)-layout: batch on lanes.
    x = x_ref[...].astype(jnp.float32)                 # (inp_dim, tm)

    # Linear 1 + LeakyReLU.  K = inp_dim (=2): a dot here lowers to a <2%%
    # utilized padded MXU pass, so do it as VPU broadcast-FMAs instead.
    w1 = w1_ref[...]                                   # (hidden, inp_dim)
    h = w1[:, 0:1] * x[0:1, :]                         # (hidden, tm)
    for k in range(1, x.shape[0]):                     # unrolled at trace time
        h = h + w1[:, k:k + 1] * x[k:k + 1, :]
    h = _leaky_relu(h + b1_ref[...])

    # Linear 2 + LeakyReLU: (hidden, hidden) @ (hidden, tm) — real MXU work.
    h = jnp.dot(w2_ref[...], h, preferred_element_type=jnp.float32) + b2_ref[...]
    h = _leaky_relu(h)

    # Linear 3 + last activation 'none'.  M = out_dim (=2) but the MXU has
    # slack in this HBM-bound kernel, so the padded dot is kept.
    h = jnp.dot(w3_ref[...], h, preferred_element_type=jnp.float32) + b3_ref[...]

    o_ref[...] = h.astype(o_ref.dtype)                 # (out_dim, tm) lane-dense store


def _round_up(a, m):
    return (a + m - 1) // m * m


def _multi_tensorcore():
    """True on parts whose 'parallel' grid axes shard across >1 TensorCore."""
    try:
        info = pltpu.get_tpu_info()
        for attr in ("num_cores", "core_count", "num_tensorcores",
                     "tensorcores_per_chip", "num_tensor_cores"):
            v = getattr(info, attr, None)
            if isinstance(v, int) and v > 0:
                return v > 1
    except Exception:
        pass
    try:
        kind = jax.devices()[0].device_kind.lower()
        return any(t in kind for t in ("v7", "7x", "v4", "v5p"))
    except Exception:
        return False


def _pick_tile(N, tm, multi_tc):
    """N-tile: multiple of 128, as large as allowed; on multi-TC parts prefer
    >= 2 and an even number of grid steps so both cores get balanced work."""
    tm_eff = max(128, (min(tm, TM_CAP) // 128) * 128)
    if multi_tc and N >= 256:
        g = pl.cdiv(N, tm_eff)
        if g < 2 or g % 2:
            g = max(2, g + (g % 2))
            tm_eff = max(128, _round_up(pl.cdiv(N, g), 128))
    if tm_eff >= N:
        tm_eff = N          # single block == full array (valid BlockSpec)
    return tm_eff


def weight_norm_params(key, in_dim, out_dim):
    """Deterministic weight_norm-style params.

    Returns W with torch Linear layout (out, in) — exactly what the (C, N)
    kernel wants — and bias as (out, 1) for lane-broadcast.
    """
    kv, kg, kb = jax.random.split(key, 3)
    v = jax.random.normal(kv, (out_dim, in_dim), jnp.float32) * 0.1
    g = jax.random.uniform(kg, (out_dim,), jnp.float32, 0.5, 1.5)
    b = jax.random.normal(kb, (out_dim,), jnp.float32) * 0.01
    # weight_norm(dim=0): W = g * v / ||v||, norm over input dim per output row
    norm = jnp.sqrt(jnp.sum(v * v, axis=1, keepdims=True))
    w = g[:, None] * v / norm                      # (out, in)
    return w, b.reshape(out_dim, 1)                # bias (out, 1)


def mlp_forward_cn(x_cn, params, *, tm=16384):
    """Channel-major entry point: x_cn (inp_dim, N) -> (out_dim, N).

    No host-side pad or transpose — preferred path when the surrounding model
    keeps activations in (C, N) layout.
    """
    inp_dim, N = x_cn.shape
    (w1, b1), (w2, b2), (w3, b3) = params
    out_dim = w3.shape[0]

    tm_eff = _pick_tile(N, tm, _multi_tensorcore())
    grid = (pl.cdiv(N, tm_eff),)

    full = lambda a: pl.BlockSpec(a.shape, lambda i: (0, 0))
    return pl.pallas_call(
        mlp_kernel,
        out_shape=jax.ShapeDtypeStruct((out_dim, N), x_cn.dtype),
        grid_spec=pltpu.PrefetchScalarGridSpec(
            num_scalar_prefetch=0,
            grid=grid,
            in_specs=[
                pl.BlockSpec((inp_dim, tm_eff), lambda i: (0, i)),
                full(w1), full(b1),
                full(w2), full(b2),
                full(w3), full(b3),
            ],
            out_specs=pl.BlockSpec((out_dim, tm_eff), lambda i: (0, i)),
        ),
        compiler_params=pltpu.CompilerParams(
            dimension_semantics=("parallel",)),
    )(x_cn, w1, b1, w2, b2, w3, b3)


def mlp_forward(x, params, *, tm=16384):
    """Row-major convenience wrapper: x (N, inp_dim) -> (N, out_dim).

    Pays two full-tensor HBM transposes; for large N prefer mlp_forward_cn.
    """
    return mlp_forward_cn(x.T, params, tm=tm).T


def mlp_reference(x, params):
    (w1, b1), (w2, b2), (w3, b3) = params
    h = x @ w1.T + b1.T
    h = jnp.where(h > 0, h, LEAKY_SLOPE * h)
    h = h @ w2.T + b2.T
    h = jnp.where(h > 0, h, LEAKY_SLOPE * h)
    return h @ w3.T + b3.T


if __name__ == "__main__":
    key = jax.random.PRNGKey(0)
    k_x, k1, k2, k3 = jax.random.split(key, 4)

    # small shapes consistent with the module's forward; N deliberately NOT a
    # multiple of 128 to exercise the ragged-last-block (no-pad) path.
    N, inp_dim, num_channels, out_dim = 300, 2, 32, 2

    x = jax.random.normal(k_x, (N, inp_dim), jnp.float32)
    params = (
        weight_norm_params(k1, inp_dim, num_channels),
        weight_norm_params(k2, num_channels, num_channels),
        weight_norm_params(k3, num_channels, out_dim),
    )

    out = mlp_forward(x, params)
    out = jax.block_until_ready(out)

    ref = mlp_reference(x, params)
    np.testing.assert_allclose(np.asarray(out), np.asarray(ref),
                               rtol=1e-5, atol=1e-5)
    print("KERNEL_OK")
</pallas_src>

<mosaic_0001>
module attributes {stable_mosaic.version = 11 : i64} {
  func.func @mlp_kernel(%arg0: i32, %arg1: memref<2x300xf32, #tpu.memory_space<vmem>>, %arg2: memref<32x2xf32, #tpu.memory_space<vmem>>, %arg3: memref<32x1xf32, #tpu.memory_space<vmem>>, %arg4: memref<32x32xf32, #tpu.memory_space<vmem>>, %arg5: memref<32x1xf32, #tpu.memory_space<vmem>>, %arg6: memref<2x32xf32, #tpu.memory_space<vmem>>, %arg7: memref<2x1xf32, #tpu.memory_space<vmem>>, %arg8: memref<2x300xf32, #tpu.memory_space<vmem>>) attributes {dimension_semantics = [#tpu.dimension_semantics<parallel>], iteration_bounds = array<i64: 1>, scalar_prefetch = 0 : i64, scratch_operands = 0 : i64, tpu.core_type = #tpu.core_type<tc>, window_params = [{transform_indices = @transform_0, window_bounds = array<i64: 2, 300>}, {pipeline_mode = #tpu.pipeline_mode<synchronous>, transform_indices = @transform_1, window_bounds = array<i64: 32, 2>}, {pipeline_mode = #tpu.pipeline_mode<synchronous>, transform_indices = @transform_2, window_bounds = array<i64: 32, 1>}, {pipeline_mode = #tpu.pipeline_mode<synchronous>, transform_indices = @transform_3, window_bounds = array<i64: 32, 32>}, {pipeline_mode = #tpu.pipeline_mode<synchronous>, transform_indices = @transform_4, window_bounds = array<i64: 32, 1>}, {pipeline_mode = #tpu.pipeline_mode<synchronous>, transform_indices = @transform_5, window_bounds = array<i64: 2, 32>}, {pipeline_mode = #tpu.pipeline_mode<synchronous>, transform_indices = @transform_6, window_bounds = array<i64: 2, 1>}, {transform_indices = @transform_7, window_bounds = array<i64: 2, 300>}]} {
    %c0 = arith.constant 0 : index
    %c0_0 = arith.constant 0 : index
    %0 = vector.load %arg1[%c0, %c0_0] : memref<2x300xf32, #tpu.memory_space<vmem>>, vector<2x300xf32>
    %c0_1 = arith.constant 0 : index
    %c0_2 = arith.constant 0 : index
    %1 = vector.load %arg2[%c0_1, %c0_2] : memref<32x2xf32, #tpu.memory_space<vmem>>, vector<32x2xf32>
    %2 = vector.extract_strided_slice %1 {offsets = [0, 0], sizes = [32, 1], strides = [1, 1]} : vector<32x2xf32> to vector<32x1xf32>
    %3 = vector.extract_strided_slice %0 {offsets = [0, 0], sizes = [1, 300], strides = [1, 1]} : vector<2x300xf32> to vector<1x300xf32>
    %4 = vector.broadcast %2 : vector<32x1xf32> to vector<32x300xf32>
    %5 = vector.broadcast %3 : vector<1x300xf32> to vector<32x300xf32>
    %6 = arith.mulf %4, %5 : vector<32x300xf32>
    %7 = vector.extract_strided_slice %1 {offsets = [0, 1], sizes = [32, 1], strides = [1, 1]} : vector<32x2xf32> to vector<32x1xf32>
    %8 = vector.extract_strided_slice %0 {offsets = [1, 0], sizes = [1, 300], strides = [1, 1]} : vector<2x300xf32> to vector<1x300xf32>
    %9 = vector.broadcast %7 : vector<32x1xf32> to vector<32x300xf32>
    %10 = vector.broadcast %8 : vector<1x300xf32> to vector<32x300xf32>
    %11 = arith.mulf %9, %10 : vector<32x300xf32>
    %12 = arith.addf %6, %11 : vector<32x300xf32>
    %c0_3 = arith.constant 0 : index
    %c0_4 = arith.constant 0 : index
    %13 = vector.load %arg3[%c0_3, %c0_4] : memref<32x1xf32, #tpu.memory_space<vmem>>, vector<32x1xf32>
    %14 = vector.broadcast %13 : vector<32x1xf32> to vector<32x300xf32>
    %15 = arith.addf %12, %14 : vector<32x300xf32>
    %cst = arith.constant 0.00999999977 : f32
    %16 = vector.broadcast %cst : f32 to vector<32x300xf32>
    %17 = arith.mulf %16, %15 : vector<32x300xf32>
    %18 = arith.maximumf %15, %17 : vector<32x300xf32>
    %c0_5 = arith.constant 0 : index
    %c0_6 = arith.constant 0 : index
    %19 = vector.load %arg4[%c0_5, %c0_6] : memref<32x32xf32, #tpu.memory_space<vmem>>, vector<32x32xf32>
    %cst_7 = arith.constant dense<0.000000e+00> : vector<32x300xf32>
    %20 = tpu.matmul %19, %18, %cst_7 {dimension_numbers = #tpu.dot_dimension_numbers<[1], [0], [0], [1], [0, 0, 1, 1], [], []>} : vector<32x32xf32>, vector<32x300xf32>, vector<32x300xf32> -> vector<32x300xf32>
    %c0_8 = arith.constant 0 : index
    %c0_9 = arith.constant 0 : index
    %21 = vector.load %arg5[%c0_8, %c0_9] : memref<32x1xf32, #tpu.memory_space<vmem>>, vector<32x1xf32>
    %22 = vector.broadcast %21 : vector<32x1xf32> to vector<32x300xf32>
    %23 = arith.addf %20, %22 : vector<32x300xf32>
    %cst_10 = arith.constant 0.00999999977 : f32
    %24 = vector.broadcast %cst_10 : f32 to vector<32x300xf32>
    %25 = arith.mulf %24, %23 : vector<32x300xf32>
    %26 = arith.maximumf %23, %25 : vector<32x300xf32>
    %c0_11 = arith.constant 0 : index
    %c0_12 = arith.constant 0 : index
    %27 = vector.load %arg6[%c0_11, %c0_12] : memref<2x32xf32, #tpu.memory_space<vmem>>, vector<2x32xf32>
    %cst_13 = arith.constant dense<0.000000e+00> : vector<2x300xf32>
    %28 = tpu.matmul %27, %26, %cst_13 {dimension_numbers = #tpu.dot_dimension_numbers<[1], [0], [0], [1], [0, 0, 1, 1], [], []>} : vector<2x32xf32>, vector<32x300xf32>, vector<2x300xf32> -> vector<2x300xf32>
    %c0_14 = arith.constant 0 : index
    %c0_15 = arith.constant 0 : index
    %29 = vector.load %arg7[%c0_14, %c0_15] : memref<2x1xf32, #tpu.memory_space<vmem>>, vector<2x1xf32>
    %30 = vector.broadcast %29 : vector<2x1xf32> to vector<2x300xf32>
    %31 = arith.addf %28, %30 : vector<2x300xf32>
    %c0_16 = arith.constant 0 : index
    %c0_17 = arith.constant 0 : index
    %32 = vector.load %arg8[%c0_16, %c0_17] : memref<2x300xf32, #tpu.memory_space<vmem>>, vector<2x300xf32>
    tpu.vector_store %arg8[%c0_16, %c0_17], %31 {strides = array<i32>} : memref<2x300xf32, #tpu.memory_space<vmem>>, vector<2x300xf32>,
    return
  }
  func.func @transform_0(%arg0: i32) -> (i32, i32) {
    %c0_i32 = arith.constant 0 : i32
    %c0_i32_0 = arith.constant 0 : i32
    return %c0_i32, %arg0 : i32, i32
  }
  func.func @transform_1(%arg0: i32) -> (i32, i32) {
    %c0_i32 = arith.constant 0 : i32
    %c0_i32_0 = arith.constant 0 : i32
    %c0_i32_1 = arith.constant 0 : i32
    return %c0_i32, %c0_i32_0 : i32, i32
  }
  func.func @transform_2(%arg0: i32) -> (i32, i32) {
    %c0_i32 = arith.constant 0 : i32
    %c0_i32_0 = arith.constant 0 : i32
    %c0_i32_1 = arith.constant 0 : i32
    return %c0_i32, %c0_i32_0 : i32, i32
  }
  func.func @transform_3(%arg0: i32) -> (i32, i32) {
    %c0_i32 = arith.constant 0 : i32
    %c0_i32_0 = arith.constant 0 : i32
    %c0_i32_1 = arith.constant 0 : i32
    return %c0_i32, %c0_i32_0 : i32, i32
  }
  func.func @transform_4(%arg0: i32) -> (i32, i32) {
    %c0_i32 = arith.constant 0 : i32
    %c0_i32_0 = arith.constant 0 : i32
    %c0_i32_1 = arith.constant 0 : i32
    return %c0_i32, %c0_i32_0 : i32, i32
  }
  func.func @transform_5(%arg0: i32) -> (i32, i32) {
    %c0_i32 = arith.constant 0 : i32
    %c0_i32_0 = arith.constant 0 : i32
    %c0_i32_1 = arith.constant 0 : i32
    return %c0_i32, %c0_i32_0 : i32, i32
  }
  func.func @transform_6(%arg0: i32) -> (i32, i32) {
    %c0_i32 = arith.constant 0 : i32
    %c0_i32_0 = arith.constant 0 : i32
    %c0_i32_1 = arith.constant 0 : i32
    return %c0_i32, %c0_i32_0 : i32, i32
  }
  func.func @transform_7(%arg0: i32) -> (i32, i32) {
    %c0_i32 = arith.constant 0 : i32
    %c0_i32_0 = arith.constant 0 : i32
    return %c0_i32, %arg0 : i32, i32
  }
}

</mosaic_0001>

<bundles_post_ra>
// kernel: tpu_custom_call.1
= control target key start
LH: loop header
LB: loop body
LE: loop exit
PB: predicated region body
PF: predicated region fallthrough
CT: control target
= control target key end

     0   :  { %v764_v2 = vmov 1   ;;  %s909_s0 = inlined_call_operand.vmem [shape: f32[2,300], index: 0, kind: input, shape index: {}]   ;;  %s910_s1 = inlined_call_operand.vmem [shape: f32[32,2], index: 1, kind: input, shape index: {}]   ;;  %s911_s2 = inlined_call_operand.vmem [shape: f32[32,1], index: 2, kind: input, shape index: {}]   ;;  %s912_s3 = inlined_call_operand.vmem [shape: f32[32,32], index: 3, kind: input, shape index: {}]   ;;  %s913_s4 = inlined_call_operand.vmem [shape: f32[32,1], index: 4, kind: input, shape index: {}]   ;;  %s914_s5 = inlined_call_operand.vmem [shape: f32[2,32], index: 5, kind: input, shape index: {}]   ;;  %s915_s6 = inlined_call_operand.vmem [shape: f32[2,1], index: 6, kind: input, shape index: {}]   ;;  %s916_s7 = inlined_call_operand.hbm [shape: f32[2,300], index: 7, kind: output, shape index: {}]  }
   0x1   :  { %v30_v0 = vld [vmem:[%s910_s1 + $0x10] sm:$0xff]  ;;  %v28_v1 = vld [vmem:[%s910_s1] sm:$0xff]  ;;  %736 = vset.pattern.permute.xlu0 %v764_v2  ;;  %734 = vset.pattern.permute.xlu1 %v764_v2  ;;  %v29_v3 = vld [vmem:[%s910_s1 + $0x8] sm:$0xff] }
   0x2   :  { %101 = vperm.xlu0 %736, %v30_v0   ;;  %93 = vperm.xlu1 %734, %v28_v1  }
   0x3   :  { %12 = vsyncpa [#allocation3], 0  ;;  %v765_v4 = vmov 0   ;;  %v31_v5 = vld [vmem:[%s910_s1 + $0x18] sm:$0xff]  ;;  %v160_v6 = vld [vmem:[%s911_s2 + $0x8] sm:$0xff]  ;;  %vm247_vm0 = vcmask 261120   ;;  %v53_v17 = vlaneseq }
   0x4   :  { %v159_v7 = vld [vmem:[%s911_s2] sm:$0xff]  ;;  %v161_v9 = vld [vmem:[%s911_s2 + $0x10] sm:$0xff]  ;;  %v162_v11 = vld [vmem:[%s911_s2 + $0x18] sm:$0xff]  ;;  %v766_v16 = vmov 0.0   ;;  %vm768_vm1 = vmmov 0   ;;  %vm629_vm2 = vcmask 1041408  }
   0x5   :  { %v223_v8 = vld [vmem:[%s913_s4] sm:$0xff]  ;;  %v225_v10 = vld [vmem:[%s913_s4 + $0x10] sm:$0xff]  ;;  %v224_v13 = vld [vmem:[%s913_s4 + $0x8] sm:$0xff]  ;;  %324 = vmatprep.mubr.f32.mxu0 %v766_v16  ;;  %v858_v18 = vshrl.u32 %v53_v17, 7  ;;  %vm630_vm3 = vcmask 1043458   ;;  %vm632_vm5 = vcmask 357380  }
   0x6   :  { %737 = vset.pattern.permute.xlu0 %v765_v4  ;;  %97 = vperm.xlu1 %734, %v29_v3   ;;  %v459_v12 = vld [vmem:[%s915_s6] sm:$0x3]  ;;  %v226_v14 = vld [vmem:[%s913_s4 + $0x18] sm:$0xff]  ;;  %vm631_vm4 = vmor %vm630_vm3, %vm629_vm2 }
   0x7   :  { %34 = vperm.xlu0 %737, %v28_v1   ;;  %v853_v15 = vld [vmem:[%s912_s3] sm:$0xff]  ;;  %v55_v21 = vsub.s32 0, %v858_v18  ;;  %v59_v22 = vsub.s32 2, %v858_v18  ;;  %v63_v23 = vsub.s32 4, %v858_v18  ;;  %v110_v24 = vsub.s32 1, %v858_v18  ;;  %vm633_vm6 = vmor %vm632_vm5, %vm631_vm4 }
   0x8   :  { %680 = vmatprep.mubr.msk.f32.mxu1 %vm247_vm0, %v853_v15  ;;  %v114_v25 = vsub.s32 3, %v858_v18  ;;  %v118_v26 = vsub.s32 5, %v858_v18  ;;  %v27_v27 = vld [vmem:[%s909_s0] sm:$0x3f] }
   0x9   :  { %v56_v30 = vrot.slane %v27_v27, %v55_v21  ;;  %v60_v31 = vrot.slane %v27_v27, %v59_v22  ;;  %v64_v32 = vrot.slane %v27_v27, %v63_v23  ;;  %v111_v33 = vrot.slane %v27_v27, %v110_v24 }
   0xa   :  { %735 = vset.pattern.permute.xlu1 %v765_v4  ;;  %v115_v34 = vrot.slane %v27_v27, %v114_v25  ;;  %v119_v35 = vrot.slane %v27_v27, %v118_v26 }
   0xb   :  { %39 = vperm.xlu0 %737, %v29_v3   ;;  %49 = vperm.xlu1 %735, %v31_v5   ;;  %v71_v36 = vrot.slane %v56_v30, %v55_v21  ;;  %v75_v37 = vrot.slane %v60_v31, %v55_v21  ;;  %v79_v38 = vrot.slane %v64_v32, %v55_v21 }
   0xc   :  { %v126_v41 = vrot.slane %v111_v33, %v110_v24  ;;  %v130_v42 = vrot.slane %v115_v34, %v110_v24  ;;  %v134_v43 = vrot.slane %v119_v35, %v110_v24 }
   0xf   :  { %44 = vperm.xlu0 %737, %v30_v0   ;;  %738 = vset.pattern.permute.xlu1 %v764_v2 }
  0x10   :  { %105 = vperm.xlu1 %738, %v31_v5  }
  0x13   :  { %170 = vperm.xlu0 %737, %v160_v6  }
  0x14   :  { %739 = vset.pattern.permute.xlu1 %v765_v4 }
  0x15   :  { %165 = vperm.xlu1 %739, %v159_v7  }
  0x17   :  { %229 = vperm.xlu0 %737, %v223_v8  }
  0x19   :  { %175 = vperm.xlu1 %739, %v161_v9  }
  0x1b   :  { %239 = vperm.xlu0 %737, %v225_v10  }
  0x1d   :  { %180 = vperm.xlu1 %739, %v162_v11  }
  0x1f   :  { %462 = vperm.xlu0 %737, %v459_v12  }
  0x21   :  { %234 = vperm.xlu1 %739, %v224_v13  }
  0x25   :  { %244 = vperm.xlu1 %739, %v226_v14  }
  0x81   :  { %v94_v19 = vpop.permute.xlu1 %93  ;;  %v102_v20 = vpop.permute.xlu0 %101 }
  0x82   :  { %v135_v51 = vmul.f32 %v126_v41, %v94_v19  ;;  %v136_v56 = vmul.f32 %v130_v42, %v94_v19  ;;  %v137_v57 = vmul.f32 %v134_v43, %v94_v19  ;;  %v141_v58 = vmul.f32 %v126_v41, %v102_v20 }
  0x83   :  { %v142_v59 = vmul.f32 %v130_v42, %v102_v20  ;;  %v143_v60 = vmul.f32 %v134_v43, %v102_v20 }
  0x85   :  { %v98_v28 = vpop.permute.xlu1 %97 }
  0x86   :  { %v35_v29 = vpop.permute.xlu0 %34  ;;  %v138_v52 = vmul.f32 %v126_v41, %v98_v28  ;;  %v139_v53 = vmul.f32 %v130_v42, %v98_v28  ;;  %v140_v54 = vmul.f32 %v134_v43, %v98_v28 }
  0x87   :  { %v80_v47 = vmul.f32 %v71_v36, %v35_v29  ;;  %v81_v48 = vmul.f32 %v75_v37, %v35_v29  ;;  %v82_v49 = vmul.f32 %v79_v38, %v35_v29 }
  0x89   :  { %v147_v2 = vadd.f32 %v135_v51, %v80_v47  ;;  %v148_v3 = vadd.f32 %v136_v56, %v81_v48  ;;  %v149_v4 = vadd.f32 %v137_v57, %v82_v49 }
  0x8a   :  { %v40_v39 = vpop.permute.xlu0 %39  ;;  %v50_v40 = vpop.permute.xlu1 %49 }
  0x8b   :  { %v83_v44 = vmul.f32 %v71_v36, %v40_v39  ;;  %v84_v45 = vmul.f32 %v75_v37, %v40_v39  ;;  %v85_v46 = vmul.f32 %v79_v38, %v40_v39  ;;  %v89_v0 = vmul.f32 %v71_v36, %v50_v40 }
  0x8c   :  { %v90_v9 = vmul.f32 %v75_v37, %v50_v40  ;;  %v91_v10 = vmul.f32 %v79_v38, %v50_v40 }
  0x8d   :  { %v150_v61 = vadd.f32 %v138_v52, %v83_v44  ;;  %v151_v62 = vadd.f32 %v139_v53, %v84_v45  ;;  %v152_v63 = vadd.f32 %v140_v54, %v85_v46 }
  0x8e   :  { %v45_v50 = vpop.permute.xlu0 %44 }
  0x8f   :  { %v106_v55 = vpop.permute.xlu1 %105  ;;  %v86_v5 = vmul.f32 %v71_v36, %v45_v50  ;;  %v87_v11 = vmul.f32 %v75_v37, %v45_v50  ;;  %v88_v12 = vmul.f32 %v79_v38, %v45_v50 }
  0x90   :  { %v144_v21 = vmul.f32 %v126_v41, %v106_v55  ;;  %v145_v22 = vmul.f32 %v130_v42, %v106_v55  ;;  %v146_v29 = vmul.f32 %v134_v43, %v106_v55 }
  0x91   :  { %v153_v25 = vadd.f32 %v141_v58, %v86_v5  ;;  %v154_v31 = vadd.f32 %v142_v59, %v87_v11  ;;  %v155_v32 = vadd.f32 %v143_v60, %v88_v12  ;;  %v222_v5 = vld [vmem:[%s912_s3 + $0x18] sm:$0xff] }
  0x92   :  { %v171_v1 = vpop.permute.xlu0 %170  ;;  %v156_v42 = vadd.f32 %v144_v21, %v89_v0  ;;  %v157_v46 = vadd.f32 %v145_v22, %v90_v9  ;;  %v158_v47 = vadd.f32 %v146_v29, %v91_v10 }
  0x93   :  { %v186_v6 = vadd.f32 %v171_v1, %v150_v61  ;;  %v187_v7 = vadd.f32 %v171_v1, %v151_v62  ;;  %v188_v8 = vadd.f32 %v171_v1, %v152_v63 }
  0x94   :  { %v166_v13 = vpop.permute.xlu1 %165 }
  0x95   :  { %v183_v14 = vadd.f32 %v166_v13, %v147_v2  ;;  %v184_v17 = vadd.f32 %v166_v13, %v148_v3  ;;  %v185_v19 = vadd.f32 %v166_v13, %v149_v4  ;;  %v199_v20 = vmul.f32 0.01, %v187_v7  ;;  %v220_v3 = vld [vmem:[%s912_s3 + $0x8] sm:$0xff]  ;;  %v221_v4 = vld [vmem:[%s912_s3 + $0x10] sm:$0xff] }
  0x96   :  { %v200_v23 = vmul.f32 0.01, %v188_v8  ;;  %v198_v24 = vmul.f32 0.01, %v186_v6 }
  0x97   :  { %v196_v26 = vmul.f32 0.01, %v184_v17  ;;  %v197_v27 = vmul.f32 0.01, %v185_v19  ;;  %v195_v28 = vmul.f32 0.01, %v183_v14  ;;  %v211_v33 = vmax.f32 %v187_v7, %v199_v20 }
  0x98   :  { %v176_v30 = vpop.permute.xlu1 %175  ;;  %v212_v36 = vmax.f32 %v188_v8, %v200_v23  ;;  %v210_v37 = vmax.f32 %v186_v6, %v198_v24  ;;  %v230_v6 = vpop.permute.xlu0 %229 }
  0x99   :  { %v189_v34 = vadd.f32 %v176_v30, %v153_v25  ;;  %v208_v35 = vmax.f32 %v184_v17, %v196_v26  ;;  %v190_v38 = vadd.f32 %v176_v30, %v154_v31  ;;  %v191_v39 = vadd.f32 %v176_v30, %v155_v32 }
  0x9a   :  { %v209_v40 = vmax.f32 %v185_v19, %v197_v27  ;;  %v207_v41 = vmax.f32 %v183_v14, %v195_v28 }
  0x9b   :  { %v697_v44 = vpack.c.bf16 %v211_v33, %v208_v35  ;;  %v201_v43 = vmul.f32 0.01, %v189_v34  ;;  %v202_v51 = vmul.f32 0.01, %v190_v38  ;;  %v203_v52 = vmul.f32 0.01, %v191_v39 }
  0x9c   :  { %v181_v45 = vpop.permute.xlu1 %180  ;;  %v705_v48 = vpack.c.bf16 %v212_v36, %v209_v40  ;;  %v699_v49 = vpack.c.bf16 %v210_v37, %v207_v41  ;;  %v240_v19 = vpop.permute.xlu0 %239 }
  0x9d   :  { %v192_v50 = vadd.f32 %v181_v45, %v156_v42  ;;  %698 = vmatprep.subr.bf16.mxu0 %v697_v44  ;;  %v193_v53 = vadd.f32 %v181_v45, %v157_v46  ;;  %v194_v54 = vadd.f32 %v181_v45, %v158_v47  ;;  %v213_v58 = vmax.f32 %v189_v34, %v201_v43 }
  0x9e   :  { %706 = vmatprep.subr.bf16.mxu1 %v705_v48  ;;  %700 = vmatpush1.bf16.msra.mxu0 %v699_v49  ;;  %v214_v60 = vmax.f32 %v190_v38, %v202_v51  ;;  %v215_v61 = vmax.f32 %v191_v39, %v203_v52 }
  0x9f   :  { %v204_v55 = vmul.f32 0.01, %v192_v50  ;;  %708 = vmatpush3.bf16.msra.mxu1 %v705_v48  ;;  %v205_v56 = vmul.f32 0.01, %v193_v53  ;;  %v206_v57 = vmul.f32 0.01, %v194_v54 }
  0xa0   :  { %v235_v7 = vpop.permute.xlu1 %234 }
  0xa1   :  { %v216_v59 = vmax.f32 %v192_v50, %v204_v55  ;;  %v217_v62 = vmax.f32 %v193_v53, %v205_v56  ;;  %v218_v63 = vmax.f32 %v194_v54, %v206_v57 }
  0xa3   :  { %v703_v0 = vpack.c.bf16 %v216_v59, %v213_v58  ;;  %v701_v1 = vpack.c.bf16 %v217_v62, %v214_v60  ;;  %v709_v2 = vpack.c.bf16 %v218_v63, %v215_v61  ;;  %v458_v58 = vld [vmem:[%s914_s5] sm:$0x3]  ;;  %s770_s5 = smov [#allocation2]  }
  0xa4   :  { %v245_v20 = vpop.permute.xlu1 %244  ;;  %s641_s10 = sshll.u32 %s770_s5, 4  ;;  %s642_s10 = int_to_ptr.vmem [resolvable:$true] %s641_s10 }
  0xa5   :  { %702 = vmatprep.subr.bf16.mxu0 %v701_v1  ;;  %710 = vmatprep.subr.bf16.mxu1 %v709_v2  ;;  %s740_s11 = scalar_lea.vmem %s642_s10, 96  ;;  %p745_p1 = scmp.lt.s32.totalorder %s642_s10, %s642_s10 }
  0xa6   :  { %704 = vmatpush1.bf16.msra.mxu0 %v703_v0  ;;  %712 = vmatpush3.bf16.msra.mxu1 %v709_v2  ;;  %p741_p0 = scmp.ne.s32.totalorder %s642_s10, %s740_s11  ;;  %p746_p2 = scmp.lt.s32.totalorder %s740_s11, %s740_s11 }
  0xa8   :  { %p747_p3 = por %p746_p2, %p745_p1 }
  0xa9   :  { %649 = vmatmul.mubr.msk.f32.vlgmr.msra.gmra.mrb[0].mxu0 %vm247_vm0, %v853_v15  ;;  %681 = vmatmul.mubr.msk.f32.vlgmr.msra.gmra.mrb[0].mxu1 %vm247_vm0, %v220_v3  ;;  %v767_v15 = vmov 0.0|0.0  }
  0xaa   :  { %330 = vmatprep.mubr.f32.mxu0 %v766_v16  ;;  %683 = vmatprep.mubr.msk.f32.mxu1 %vm247_vm0, %v221_v4  ;;  %p748_p4 = pnand %p747_p3, %p741_p0 }
  0xab   :  { %721 = vmatprep.subr.bf16.mxu0 %v767_v15 }
  0xad   :  { %650 = vmatmul.mubr.msk.f32.gmra.mrb[2].mxu0 %vm247_vm0, %v220_v3  ;;  %684 = vmatmul.mubr.msk.f32.gmra.mrb[2].mxu1 %vm247_vm0, %v222_v5 }
  0xae   :  { %336 = vmatprep.mubr.f32.mxu0 %v766_v16  ;;  %532 = vmatprep.mubr.f32.mxu1 %v766_v16 }
  0xb1   :  { %651 = vmatmul.mubr.msk.f32.gmra.mrb[4].mxu0 %vm247_vm0, %v221_v4 }
  0xb2   :  { %342 = vmatprep.mubr.f32.mxu0 %v766_v16 }
  0xb5   :  { %652 = vmatmul.mubr.msk.f32.gmra.mrb[6].mxu0 %vm247_vm0, %v222_v5  ;;  %v769_v5 = vmov 1983009808  }
  0xb6   :  { %694 = vmatprep.mubr.msk.f32.mxu0 %vm768_vm1, %v766_v16 }
 0x17c   :  { %v326_v8 = vpop.f32.mrb[0].mxu0  ;;  %v682_v9 = vpop.f32.mrb[0].mxu1 }
 0x17d   :  { %v327_v10 = vadd.f32 %v326_v8, %v230_v6  ;;  %v421_v11 = vadd.f32 %v682_v9, %v235_v7  ;;  %v328_v12 = vpop.f32.mrb[1].mxu0  ;;  %v415_v13 = vpop.f32.mrb[1].mxu1 }
 0x17e   :  { %v329_v14 = vadd.f32 %v328_v12, %v230_v6  ;;  %v416_v17 = vadd.f32 %v415_v13, %v230_v6 }
 0x17f   :  { %v439_v21 = vmul.f32 0.01, %v421_v11  ;;  %v434_v25 = vmul.f32 0.01, %v327_v10 }
 0x180   :  { %v436_v22 = vmul.f32 0.01, %v416_v17  ;;  %v332_v23 = vpop.f32.mrb[2].mxu0  ;;  %v685_v24 = vpop.f32.mrb[2].mxu1  ;;  %v435_v30 = vmul.f32 0.01, %v329_v14 }
 0x181   :  { %v451_v26 = vmax.f32 %v421_v11, %v439_v21  ;;  %v333_v27 = vadd.f32 %v332_v23, %v235_v7  ;;  %v431_v16 = vadd.f32 %v685_v24, %v245_v20  ;;  %v334_v28 = vpop.f32.mrb[3].mxu0  ;;  %v425_v29 = vpop.f32.mrb[3].mxu1  ;;  %v446_v40 = vmax.f32 %v327_v10, %v434_v25 }
 0x182   :  { %v448_v31 = vmax.f32 %v416_v17, %v436_v22  ;;  %v335_v32 = vadd.f32 %v334_v28, %v235_v7  ;;  %v426_v33 = vadd.f32 %v425_v29, %v240_v19  ;;  %v447_v46 = vmax.f32 %v329_v14, %v435_v30  ;;  %v463_v7 = vpop.permute.xlu0 %462 }
 0x183   :  { %v437_v34 = vmul.f32 0.01, %v333_v27  ;;  %v445_v35 = vmul.f32 0.01, %v431_v16 }
 0x184   :  { %v722_v36 = vpack.c.bf16 %v451_v26, %v448_v31  ;;  %v438_v37 = vmul.f32 0.01, %v335_v32  ;;  %v442_v38 = vmul.f32 0.01, %v426_v33  ;;  %v338_v39 = vpop.f32.mrb[4].mxu0 }
 0x185   :  { %v449_v41 = vmax.f32 %v333_v27, %v437_v34  ;;  %v457_v42 = vmax.f32 %v431_v16, %v445_v35  ;;  %v339_v44 = vadd.f32 %v338_v39, %v240_v19  ;;  %v340_v45 = vpop.f32.mrb[5].mxu0 }
 0x186   :  { %v450_v47 = vmax.f32 %v335_v32, %v438_v37  ;;  %v454_v48 = vmax.f32 %v426_v33, %v442_v38  ;;  %v341_v49 = vadd.f32 %v340_v45, %v240_v19  ;;  %723 = vmatpush3.bf16.msra.mxu0 %v722_v36 }
 0x187   :  { %v715_v43 = vpack.c.bf16 %v449_v41, %v446_v40  ;;  %724 = vmatprep.subr.bf16.mxu0 %v767_v15  ;;  %v440_v53 = vmul.f32 0.01, %v339_v44  ;;  %v614_v15 = vunpack.c.l.s4 %v769_v5 }
 0x188   :  { %v725_v50 = vpack.c.bf16 %v457_v42, %v454_v48  ;;  %v344_v51 = vpop.f32.mrb[6].mxu0  ;;  %v713_v52 = vpack.c.bf16 %v450_v47, %v447_v46  ;;  %v441_v56 = vmul.f32 0.01, %v341_v49 }
 0x189   :  { %v345_v54 = vadd.f32 %v344_v51, %v245_v20  ;;  %v346_v55 = vpop.f32.mrb[7].mxu0  ;;  %v452_v61 = vmax.f32 %v339_v44, %v440_v53  ;;  %v615_v6 = vunpack.c.0.s8 %v614_v15 }
 0x18a   :  { %v347_v57 = vadd.f32 %v346_v55, %v245_v20  ;;  %714 = vmatprep.subr.bf16.mxu1 %v713_v52  ;;  %726 = vmatpush3.bf16.msra.mxu0 %v725_v50  ;;  %v453_v63 = vmax.f32 %v341_v49, %v441_v56 }
 0x18b   :  { %v443_v59 = vmul.f32 0.01, %v345_v54  ;;  %716 = vmatpush1.bf16.msra.mxu1 %v715_v43  ;;  %v618_v12 = vsub.s32 %v615_v6, %v858_v18 }
 0x18c   :  { %v444_v60 = vmul.f32 0.01, %v347_v57 }
 0x18d   :  { %v455_v62 = vmax.f32 %v345_v54, %v443_v59  ;;  %695 = vmatmul.mubr.msk.f32.vlgmr.msra.gmra.mrb[8].mxu0 %vm247_vm0, %v458_v58 }
 0x18e   :  { %v456_v0 = vmax.f32 %v347_v57, %v444_v60 }
 0x18f   :  { %v719_v1 = vpack.c.bf16 %v455_v62, %v452_v61 }
 0x190   :  { %v717_v2 = vpack.c.bf16 %v456_v0, %v453_v63 }
 0x192   :  { %718 = vmatprep.subr.bf16.mxu1 %v717_v2 }
 0x193   :  { %720 = vmatpush1.bf16.msra.mxu1 %v719_v1 }
 0x196   :  { %657 = vmatmul.mubr.msk.f32.vlgmr.msra.gmra.mrb[4].mxu1 %vm247_vm0, %v458_v58 }
 0x260   :  { %v605_v3 = vpop.f32.mrb[8].mxu0 }
 0x261   :  { %v696_v4 = vpop.f32.mrb[9].mxu0  ;;  %v606_v11 = vadd.f32 %v605_v3, %v463_v7 }
 0x263   :  { %v626_v17 = vrot.slane %v606_v11, %v618_v12 }
 0x269   :  { %v534_v8 = vpop.f32.mrb[4].mxu1 }
 0x26a   :  { %v535_v9 = vadd.f32 %v534_v8, %v463_v7  ;;  %v536_v10 = vpop.f32.mrb[5].mxu1 }
 0x26b   :  { %v537_v13 = vadd.f32 %v536_v10, %v463_v7 }
 0x26d   :  { %v612_v14 = vcombine.low %v535_v9, %v537_v13 }
 0x26f   :  { %v619_v19 = vrot.slane %v612_v14, %v618_v12 }
 0x271   :  { %v627_v20 = vcombine.low %v619_v19, %v626_v17 }
 0x273   :  { %634 = vst.msk [vmem:[#allocation2] sm:$0x3f] %vm633_vm6, %v627_v20 }
 0x274   :  { %751 = shalt.err (!%p748_p4)
}
 0x275   :  { %s752_s14 = scalar_lea.hbm %s916_s7, 96 }
 0x276   :  { %p753_p5 = scmp.ne.s32.totalorder %s916_s7, %s752_s14  ;;  %p756_p6 = scmp.lt.u32.totalorder %s752_s14, %s916_s7 }
 0x278   :  { %p758_p7 = pnand %p756_p6, %p753_p5 }
 0x27a   :  { %761 = shalt.err (!%p758_p7)
}
 0x27b   :  { %644 = dma.vmem_to_hbm [thread:$0]  %s642_s10, 96, %s916_s7, [#allocation3]  }
 0x27c   :  { %762 = dma.done.wait [#allocation3], 96  }
 0x27d   :  { %763 = vsyncadd [#allocation3], 4294967200 }
 0x27e   :  { %648 = vsyncpa [#allocation3], 1 }

</bundles_post_ra>
